<compile_context>
chip_gen: v7x
topology: tpu7x:2x2x1
jax: 0.10.0
libtpu: 0.0.40
codegen_flags: <defaults>
</compile_context>

<pallas_src>
import math

import numpy as np
import jax
import jax.numpy as jnp
from jax import lax
from jax.experimental import pallas as pl
from jax.experimental.pallas import tpu as pltpu

# -----------------------------------------------------------------------------
# Synthetic SegmentedTensorProduct descriptor (stands in for `d` in __init__).
# operand_segment_modes = ("u", "iu", "ju", "ku"), coefficient subscripts "ijk"
# -----------------------------------------------------------------------------
MUL = 128                      # "u" mode multiplicity
MATH_DTYPE = jnp.float32       # math_dtype argument of FusedTP4

# operand_segment_shapes
OP0_SEGMENTS = [(MUL,), (MUL,), (MUL,), (MUL,)]          # weights, mode "u"
OP1_SEGMENTS = [(1, MUL), (3, MUL)]                      # x, mode "iu"  (0e, 1o)
OP2_SEGMENTS = [(1, MUL), (3, MUL)]                      # y, mode "ju"  (0e, 1o)
OP3_SEGMENTS = [(1, MUL), (3, MUL)]                      # out, mode "ku" (0e, 1o)


def _offsets_and_size(segments):
    offs, off = [], 0
    for shp in segments:
        offs.append(off)
        off += int(np.prod(shp))
    return offs, off


OP0_OFFSETS, OP0_SIZE = _offsets_and_size(OP0_SEGMENTS)
OP1_OFFSETS, OP1_SIZE = _offsets_and_size(OP1_SEGMENTS)
OP2_OFFSETS, OP2_SIZE = _offsets_and_size(OP2_SEGMENTS)
OP3_OFFSETS, OP3_SIZE = _offsets_and_size(OP3_SEGMENTS)
TOTAL_ROW_ELEMS = OP0_SIZE + OP1_SIZE + OP2_SIZE + OP3_SIZE

# path_coefficients (Clebsch-Gordan-like, deterministic)
_c_000 = np.ones((1, 1, 1), np.float64)                              # 0e x 0e -> 0e
_c_011 = np.eye(3, dtype=np.float64).reshape(1, 3, 3)                # 0e x 1o -> 1o
_c_110 = (np.eye(3, dtype=np.float64) / math.sqrt(3.0)).reshape(3, 3, 1)  # 1o x 1o -> 0e
_c_111 = np.zeros((3, 3, 3), np.float64)                             # 1o x 1o -> 1o (cross)
for _i, _j, _k, _s in [(0, 1, 2, 1), (1, 2, 0, 1), (2, 0, 1, 1),
                       (1, 0, 2, -1), (2, 1, 0, -1), (0, 2, 1, -1)]:
    _c_111[_i, _j, _k] = _s / math.sqrt(2.0)

# path_indices + path_coefficients
PATHS = [
    ((0, 0, 0, 0), _c_000),
    ((1, 0, 1, 1), _c_011),
    ((2, 1, 1, 0), _c_110),
    ((3, 1, 1, 1), _c_111),
]


def _cdiv(a, b):
    return (a + b - 1) // b


def _round_up(a, b):
    return _cdiv(a, b) * b


def _vmem_capacity_bytes():
    try:
        return int(pltpu.get_tpu_info().vmem_capacity_bytes)
    except Exception:
        return 64 << 20  # conservative fallback (v7x physical VMEM per TC)


# -----------------------------------------------------------------------------
# Pallas kernel: one batch tile, processed in row chunks to bound live VMEM
# -----------------------------------------------------------------------------
def _make_tp4_kernel(row_chunk, n_chunks):

    def chunk_compute(r0, w_ref, x_ref, y_ref, o_ref):
        rows = pl.ds(r0, row_chunk)

        # trace-time caches for per-chunk, per-128-lane input slices
        x_cache, y_cache = {}, {}

        def x_slice(s1, i):
            key = (s1, i)
            if key not in x_cache:
                off = OP1_OFFSETS[s1] + i * MUL
                x_cache[key] = x_ref[rows, off:off + MUL].astype(MATH_DTYPE)
            return x_cache[key]

        def y_slice(s2, j):
            key = (s2, j)
            if key not in y_cache:
                off = OP2_OFFSETS[s2] + j * MUL
                y_cache[key] = y_ref[rows, off:off + MUL].astype(MATH_DTYPE)
            return y_cache[key]

        # lazy accumulators: (out segment, k component) -> (row_chunk, MUL) f32
        acc = {}

        # paths are static -> fully unrolled at trace time
        for (s0, s1, s2, s3), coeff in PATHS:
            di = OP1_SEGMENTS[s1][0]
            dj = OP2_SEGMENTS[s2][0]
            dk = OP3_SEGMENTS[s3][0]

            nz = coeff[coeff != 0.0]
            if nz.size == 0:
                continue
            # If all nonzero coefficients of the path share a magnitude, fold
            # it into the weight once. NOTE: the exact-float fast paths below
            # (c == +/-1) are correct for arbitrary descriptors; they only fall
            # back to the generic multiply when the compare fails.
            common = float(np.abs(nz[0])) if np.allclose(np.abs(nz), np.abs(nz[0])) else 1.0

            w_off = OP0_OFFSETS[s0]
            wseg = w_ref[rows, w_off:w_off + MUL].astype(MATH_DTYPE)
            w_c = wseg if common == 1.0 else wseg * common

            # contract (i, j) -> k first, then a single multiply by the weight
            for k in range(dk):
                t = None
                for i in range(di):
                    for j in range(dj):
                        c = float(coeff[i, j, k]) / common
                        if c == 0.0:
                            continue
                        p = x_slice(s1, i) * y_slice(s2, j)
                        if t is None:
                            t = p if c == 1.0 else (-p if c == -1.0 else c * p)
                        elif c == 1.0:
                            t = t + p
                        elif c == -1.0:
                            t = t - p
                        else:
                            t = t + c * p
                if t is not None:
                    contrib = w_c * t
                    key = (s3, k)
                    acc[key] = contrib if key not in acc else acc[key] + contrib

        # per-segment, per-component stores: 128-lane aligned, unmasked vst
        for s3, seg in enumerate(OP3_SEGMENTS):
            base = OP3_OFFSETS[s3]
            for k in range(seg[0]):
                a = acc.get((s3, k))
                if a is None:
                    a = jnp.zeros((row_chunk, MUL), MATH_DTYPE)
                o_ref[rows, base + k * MUL: base + (k + 1) * MUL] = a.astype(o_ref.dtype)

    def kernel(w_ref, x_ref, y_ref, o_ref):
        if n_chunks == 1:
            chunk_compute(0, w_ref, x_ref, y_ref, o_ref)
        else:
            def body(c, carry):
                r0 = pl.multiple_of(c * row_chunk, row_chunk)
                chunk_compute(r0, w_ref, x_ref, y_ref, o_ref)
                return carry
            lax.fori_loop(0, n_chunks, body, 0, unroll=(n_chunks <= 8))

    return kernel


# -----------------------------------------------------------------------------
# Wrapper (the FusedTP4.forward equivalent)
# -----------------------------------------------------------------------------
def fused_tp4(w, x, y, *, tile_z=1024, row_chunk=None):
    """out[z] = sum_p C_p[i,j,k] * w[z,s0,u] * x[z,s1,i,u] * y[z,s2,j,u].

    Dtype-polymorphic: pass bf16 inputs to halve HBM traffic (kernel math stays
    float32); output dtype follows x.dtype.
    """
    Z = x.shape[0]
    assert w.shape == (Z, OP0_SIZE) and x.shape == (Z, OP1_SIZE) and y.shape == (Z, OP2_SIZE)

    itemsize = jnp.dtype(x.dtype).itemsize
    row_io_bytes = TOTAL_ROW_ELEMS * itemsize

    # --- VMEM budget: double-buffered I/O blocks + in-kernel f32 temporaries ---
    vmem_cap = max(int(0.75 * _vmem_capacity_bytes()), 32 << 20)
    scratch_ub = 40 * 256 * MUL * 4          # upper bound on traced temporaries/chunk
    budget = vmem_cap - scratch_ub - (4 << 20)
    tz_vmem_max = max(8, (budget // (2 * row_io_bytes)) // 8 * 8)

    # --- batch tile: >=2 grid steps when Z allows (keeps both v7x TCs busy),
    #     multiple of 8 rows, capped by the VMEM budget ---
    tz = min(_round_up(tile_z, 8), _round_up(max(_cdiv(Z, 2), 1), 8), tz_vmem_max)
    tz = max(tz, 8)

    # --- in-kernel row chunk: bounds live intermediates; tz multiple of it ---
    rc = row_chunk if row_chunk is not None else min(256, tz)
    rc = max(8, min(_round_up(rc, 8), tz))
    tz = max(rc, (tz // rc) * rc)
    assert tz % rc == 0
    n_chunks = tz // rc

    grid = (_cdiv(Z, tz),)   # no padding: Pallas masks the partial final block

    dma_bytes = 2 * tz * row_io_bytes                    # double-buffered blocks
    scratch_bytes = 40 * rc * MUL * 4                    # actual temporaries/chunk
    vmem_limit = int(min(max(dma_bytes + scratch_bytes + (4 << 20), 32 << 20), vmem_cap))

    # ~36 VALU ops per lane per batch row for this descriptor; mem-bound hint
    cost = pl.CostEstimate(flops=int(36 * MUL * Z),
                           transcendentals=0,
                           bytes_accessed=int(Z * row_io_bytes))

    return pl.pallas_call(
        _make_tp4_kernel(rc, n_chunks),
        out_shape=jax.ShapeDtypeStruct((Z, OP3_SIZE), x.dtype),
        grid_spec=pltpu.PrefetchScalarGridSpec(
            num_scalar_prefetch=0,
            grid=grid,
            in_specs=[
                pl.BlockSpec((tz, OP0_SIZE), lambda z: (z, 0)),
                pl.BlockSpec((tz, OP1_SIZE), lambda z: (z, 0)),
                pl.BlockSpec((tz, OP2_SIZE), lambda z: (z, 0)),
            ],
            out_specs=pl.BlockSpec((tz, OP3_SIZE), lambda z: (z, 0)),
        ),
        compiler_params=pltpu.CompilerParams(
            dimension_semantics=("parallel",),
            vmem_limit_bytes=vmem_limit),
        cost_estimate=cost,
    )(w, x, y)


# -----------------------------------------------------------------------------
# Pure-JAX reference (same math, used for validation)
# -----------------------------------------------------------------------------
def fused_tp4_reference(w, x, y):
    Z = x.shape[0]
    out = jnp.zeros((Z, OP3_SIZE), MATH_DTYPE)
    for (s0, s1, s2, s3), coeff in PATHS:
        di = OP1_SEGMENTS[s1][0]
        dj = OP2_SEGMENTS[s2][0]
        dk = OP3_SEGMENTS[s3][0]
        wseg = w[:, OP0_OFFSETS[s0]:OP0_OFFSETS[s0] + MUL].astype(MATH_DTYPE)
        xs = x[:, OP1_OFFSETS[s1]:OP1_OFFSETS[s1] + di * MUL].reshape(Z, di, MUL)
        ys = y[:, OP2_OFFSETS[s2]:OP2_OFFSETS[s2] + dj * MUL].reshape(Z, dj, MUL)
        seg = jnp.einsum("ijk,zu,ziu,zju->zku",
                         jnp.asarray(coeff, MATH_DTYPE),
                         wseg, xs.astype(MATH_DTYPE), ys.astype(MATH_DTYPE))
        off = OP3_OFFSETS[s3]
        out = out.at[:, off:off + dk * MUL].add(seg.reshape(Z, dk * MUL))
    return out.astype(x.dtype)


# -----------------------------------------------------------------------------
if __name__ == "__main__":
    key = jax.random.PRNGKey(0)
    kw, kx, ky = jax.random.split(key, 3)

    # case 1: small batch, f32 I/O
    Z = 16
    w = jax.random.normal(kw, (Z, OP0_SIZE), jnp.float32)
    x = jax.random.normal(kx, (Z, OP1_SIZE), jnp.float32)
    y = jax.random.normal(ky, (Z, OP2_SIZE), jnp.float32)

    out = jax.block_until_ready(fused_tp4(w, x, y))
    ref = jax.block_until_ready(fused_tp4_reference(w, x, y))
    assert out.shape == (Z, OP3_SIZE), out.shape
    np.testing.assert_allclose(np.asarray(out), np.asarray(ref),
                               rtol=1e-4, atol=1e-4)

    # case 2: batch not a multiple of the tile (exercises the masked partial
    # final block; no padding round-trips)
    Z2 = 13
    out2 = jax.block_until_ready(fused_tp4(w[:Z2], x[:Z2], y[:Z2]))
    ref2 = fused_tp4_reference(w[:Z2], x[:Z2], y[:Z2])
    np.testing.assert_allclose(np.asarray(out2), np.asarray(ref2),
                               rtol=1e-4, atol=1e-4)

    # case 3: multi-chunk inner loop (exercises the lax.fori_loop row-chunk path)
    Z3 = 64
    w3 = jax.random.normal(kw, (Z3, OP0_SIZE), jnp.float32)
    x3 = jax.random.normal(kx, (Z3, OP1_SIZE), jnp.float32)
    y3 = jax.random.normal(ky, (Z3, OP2_SIZE), jnp.float32)
    out3 = jax.block_until_ready(fused_tp4(w3, x3, y3, tile_z=32, row_chunk=16))
    ref3 = fused_tp4_reference(w3, x3, y3)
    np.testing.assert_allclose(np.asarray(out3), np.asarray(ref3),
                               rtol=1e-4, atol=1e-4)

    # case 4: bf16 I/O (halves HBM traffic of this bandwidth-bound kernel;
    # math stays f32 inside the kernel)
    wb, xb, yb = (a.astype(jnp.bfloat16) for a in (w, x, y))
    outb = jax.block_until_ready(fused_tp4(wb, xb, yb))
    refb = fused_tp4_reference(wb, xb, yb)
    assert outb.dtype == jnp.bfloat16
    np.testing.assert_allclose(np.asarray(outb.astype(jnp.float32)),
                               np.asarray(refb.astype(jnp.float32)),
                               rtol=2e-2, atol=2e-2)

    print("KERNEL_OK")
</pallas_src>

<mosaic_0001>
module attributes {stable_mosaic.version = 11 : i64} {
  func.func @kernel(%arg0: i32, %arg1: memref<8x512xf32, #tpu.memory_space<vmem>>, %arg2: memref<8x512xf32, #tpu.memory_space<vmem>>, %arg3: memref<8x512xf32, #tpu.memory_space<vmem>>, %arg4: memref<8x512xf32, #tpu.memory_space<vmem>>) attributes {dimension_semantics = [#tpu.dimension_semantics<parallel>], iteration_bounds = array<i64: 2>, scalar_prefetch = 0 : i64, scratch_operands = 0 : i64, tpu.core_type = #tpu.core_type<tc>, window_params = [{transform_indices = @transform_0, window_bounds = array<i64: 8, 512>}, {transform_indices = @transform_1, window_bounds = array<i64: 8, 512>}, {transform_indices = @transform_2, window_bounds = array<i64: 8, 512>}, {transform_indices = @transform_3, window_bounds = array<i64: 8, 512>}]} {
    %c0 = arith.constant 0 : index
    %c0_0 = arith.constant 0 : index
    %0 = vector.load %arg1[%c0, %c0_0] : memref<8x512xf32, #tpu.memory_space<vmem>>, vector<8x128xf32>
    %c0_1 = arith.constant 0 : index
    %c0_2 = arith.constant 0 : index
    %1 = vector.load %arg2[%c0_1, %c0_2] : memref<8x512xf32, #tpu.memory_space<vmem>>, vector<8x128xf32>
    %c0_3 = arith.constant 0 : index
    %c0_4 = arith.constant 0 : index
    %2 = vector.load %arg3[%c0_3, %c0_4] : memref<8x512xf32, #tpu.memory_space<vmem>>, vector<8x128xf32>
    %3 = arith.mulf %1, %2 : vector<8x128xf32>
    %4 = arith.mulf %0, %3 : vector<8x128xf32>
    %c0_5 = arith.constant 0 : index
    %c128 = arith.constant 128 : index
    %5 = vector.load %arg1[%c0_5, %c128] : memref<8x512xf32, #tpu.memory_space<vmem>>, vector<8x128xf32>
    %c0_6 = arith.constant 0 : index
    %c128_7 = arith.constant 128 : index
    %6 = vector.load %arg3[%c0_6, %c128_7] : memref<8x512xf32, #tpu.memory_space<vmem>>, vector<8x128xf32>
    %7 = arith.mulf %1, %6 : vector<8x128xf32>
    %8 = arith.mulf %5, %7 : vector<8x128xf32>
    %c0_8 = arith.constant 0 : index
    %c256 = arith.constant 256 : index
    %9 = vector.load %arg3[%c0_8, %c256] : memref<8x512xf32, #tpu.memory_space<vmem>>, vector<8x128xf32>
    %10 = arith.mulf %1, %9 : vector<8x128xf32>
    %11 = arith.mulf %5, %10 : vector<8x128xf32>
    %c0_9 = arith.constant 0 : index
    %c384 = arith.constant 384 : index
    %12 = vector.load %arg3[%c0_9, %c384] : memref<8x512xf32, #tpu.memory_space<vmem>>, vector<8x128xf32>
    %13 = arith.mulf %1, %12 : vector<8x128xf32>
    %14 = arith.mulf %5, %13 : vector<8x128xf32>
    %c0_10 = arith.constant 0 : index
    %c256_11 = arith.constant 256 : index
    %15 = vector.load %arg1[%c0_10, %c256_11] : memref<8x512xf32, #tpu.memory_space<vmem>>, vector<8x128xf32>
    %cst = arith.constant 0.577350259 : f32
    %16 = vector.broadcast %cst : f32 to vector<8x128xf32>
    %17 = arith.mulf %15, %16 : vector<8x128xf32>
    %c0_12 = arith.constant 0 : index
    %c128_13 = arith.constant 128 : index
    %18 = vector.load %arg2[%c0_12, %c128_13] : memref<8x512xf32, #tpu.memory_space<vmem>>, vector<8x128xf32>
    %19 = arith.mulf %18, %6 : vector<8x128xf32>
    %c0_14 = arith.constant 0 : index
    %c256_15 = arith.constant 256 : index
    %20 = vector.load %arg2[%c0_14, %c256_15] : memref<8x512xf32, #tpu.memory_space<vmem>>, vector<8x128xf32>
    %21 = arith.mulf %20, %9 : vector<8x128xf32>
    %22 = arith.addf %19, %21 : vector<8x128xf32>
    %c0_16 = arith.constant 0 : index
    %c384_17 = arith.constant 384 : index
    %23 = vector.load %arg2[%c0_16, %c384_17] : memref<8x512xf32, #tpu.memory_space<vmem>>, vector<8x128xf32>
    %24 = arith.mulf %23, %12 : vector<8x128xf32>
    %25 = arith.addf %22, %24 : vector<8x128xf32>
    %26 = arith.mulf %17, %25 : vector<8x128xf32>
    %27 = arith.addf %4, %26 : vector<8x128xf32>
    %c0_18 = arith.constant 0 : index
    %c384_19 = arith.constant 384 : index
    %28 = vector.load %arg1[%c0_18, %c384_19] : memref<8x512xf32, #tpu.memory_space<vmem>>, vector<8x128xf32>
    %cst_20 = arith.constant 0.707106769 : f32
    %29 = vector.broadcast %cst_20 : f32 to vector<8x128xf32>
    %30 = arith.mulf %28, %29 : vector<8x128xf32>
    %31 = arith.mulf %20, %12 : vector<8x128xf32>
    %32 = arith.mulf %23, %9 : vector<8x128xf32>
    %33 = arith.subf %31, %32 : vector<8x128xf32>
    %34 = arith.mulf %30, %33 : vector<8x128xf32>
    %35 = arith.addf %8, %34 : vector<8x128xf32>
    %36 = arith.mulf %18, %12 : vector<8x128xf32>
    %cst_21 = arith.constant 0.000000e+00 : f32
    %37 = vector.broadcast %cst_21 : f32 to vector<8x128xf32>
    %38 = arith.subf %37, %36 : vector<8x128xf32>
    %39 = arith.mulf %23, %6 : vector<8x128xf32>
    %40 = arith.addf %38, %39 : vector<8x128xf32>
    %41 = arith.mulf %30, %40 : vector<8x128xf32>
    %42 = arith.addf %11, %41 : vector<8x128xf32>
    %43 = arith.mulf %18, %9 : vector<8x128xf32>
    %44 = arith.mulf %20, %6 : vector<8x128xf32>
    %45 = arith.subf %43, %44 : vector<8x128xf32>
    %46 = arith.mulf %30, %45 : vector<8x128xf32>
    %47 = arith.addf %14, %46 : vector<8x128xf32>
    %c0_22 = arith.constant 0 : index
    %c0_23 = arith.constant 0 : index
    %48 = vector.load %arg4[%c0_22, %c0_23] : memref<8x512xf32, #tpu.memory_space<vmem>>, vector<8x128xf32>
    tpu.vector_store %arg4[%c0_22, %c0_23], %27 {strides = array<i32>} : memref<8x512xf32, #tpu.memory_space<vmem>>, vector<8x128xf32>,
    %c0_24 = arith.constant 0 : index
    %c128_25 = arith.constant 128 : index
    %49 = vector.load %arg4[%c0_24, %c128_25] : memref<8x512xf32, #tpu.memory_space<vmem>>, vector<8x128xf32>
    tpu.vector_store %arg4[%c0_24, %c128_25], %35 {strides = array<i32>} : memref<8x512xf32, #tpu.memory_space<vmem>>, vector<8x128xf32>,
    %c0_26 = arith.constant 0 : index
    %c256_27 = arith.constant 256 : index
    %50 = vector.load %arg4[%c0_26, %c256_27] : memref<8x512xf32, #tpu.memory_space<vmem>>, vector<8x128xf32>
    tpu.vector_store %arg4[%c0_26, %c256_27], %42 {strides = array<i32>} : memref<8x512xf32, #tpu.memory_space<vmem>>, vector<8x128xf32>,
    %c0_28 = arith.constant 0 : index
    %c384_29 = arith.constant 384 : index
    %51 = vector.load %arg4[%c0_28, %c384_29] : memref<8x512xf32, #tpu.memory_space<vmem>>, vector<8x128xf32>
    tpu.vector_store %arg4[%c0_28, %c384_29], %47 {strides = array<i32>} : memref<8x512xf32, #tpu.memory_space<vmem>>, vector<8x128xf32>,
    return
  }
  func.func @transform_0(%arg0: i32) -> (i32, i32) {
    %c0_i32 = arith.constant 0 : i32
    %c0_i32_0 = arith.constant 0 : i32
    return %arg0, %c0_i32 : i32, i32
  }
  func.func @transform_1(%arg0: i32) -> (i32, i32) {
    %c0_i32 = arith.constant 0 : i32
    %c0_i32_0 = arith.constant 0 : i32
    return %arg0, %c0_i32 : i32, i32
  }
  func.func @transform_2(%arg0: i32) -> (i32, i32) {
    %c0_i32 = arith.constant 0 : i32
    %c0_i32_0 = arith.constant 0 : i32
    return %arg0, %c0_i32 : i32, i32
  }
  func.func @transform_3(%arg0: i32) -> (i32, i32) {
    %c0_i32 = arith.constant 0 : i32
    %c0_i32_0 = arith.constant 0 : i32
    return %arg0, %c0_i32 : i32, i32
  }
}

</mosaic_0001>

<bundles_post_ra>
// kernel: tpu_custom_call.1
= control target key start
LH: loop header
LB: loop body
LE: loop exit
PB: predicated region body
PF: predicated region fallthrough
CT: control target
= control target key end

     0   :  { %s940_s0 = inlined_call_operand.hbm [shape: f32[16,512], index: 0, kind: input, shape index: {}]   ;;  %s941_s1 = inlined_call_operand.hbm [shape: f32[16,512], index: 1, kind: input, shape index: {}]   ;;  %s942_s2 = inlined_call_operand.hbm [shape: f32[16,512], index: 2, kind: input, shape index: {}]   ;;  %s943_s3 = inlined_call_operand.hbm [shape: f32[16,512], index: 3, kind: output, shape index: {}]  }
   0x1   :  { %948 = sst [smem:[#allocation12_spill]] %s941_s1 }
   0x2   :  { %8 = vsyncpa [#allocation3], 0 }
   0x3   :  { %10 = vsyncpa [#allocation3 + $0x1], 0 }
   0x4   :  { %11 = vsyncpa [#allocation6], 0 }
   0x5   :  { %13 = vsyncpa [#allocation6 + $0x1], 0 }
   0x6   :  { %14 = vsyncpa [#allocation4], 0 }
   0x7   :  { %16 = vsyncpa [#allocation4 + $0x1], 0  ;;  %s705_s12 = smov 0   ;;  %s707_s13 = smov 0  }
   0x8   :  { %s709_s14 = smov 0   ;;  %s711_s15 = smov 0  }
   0x9 LB: > { %s726_s16 = sadd.s32 4294967295, %s679_s15   ;;  %s437_s17 = sadd.s32 4294967294, %s679_s15   ;;  %s679_s15 = sphi %s711_s15, %s967_s15   ;;  %s675_s14 = sphi %s709_s14, %s966_s14   ;;  %s671_s13 = sphi %s707_s13, %s965_s13   ;;  %s667_s12 = sphi %s705_s12, %s964_s12  }
   0xa   : > { %s730_s18 = sadd.s32 1, %s679_s15   ;;  %s29_s19 = sadd.s32 1, %s675_s14 }
   0xb   : > { %s26_s20 = ssub.s32 %s679_s15, %s730_s18  ;;  %p36_p0 = scmp.ne.s32.totalorder %s675_s14, %s671_s13 }
   0xc   : > { %p27_p1 = scmp.eq.s32.totalorder %s26_s20, 0  ;;  %p37_p2 = scmp.eq.s32.totalorder %s679_s15, 0 }
   0xd   : > { %p42_p3 = scmp.ne.s32.totalorder %s671_s13, %s667_s12  ;;  %p43_p4 = scmp.eq.s32.totalorder %s726_s16, 0 }
   0xe   : > { %s742_s21 = scalar_select %p27_p1, %s675_s14, %s29_s19  }
   0xf   : > { %p38_p5 = por %p37_p2, %p36_p0  ;;  %p744_p6 = por %p43_p4, %p42_p3 }
  0x10   : > { %p118_p7 = scmp.eq.s32.totalorder %s726_s16, 1  ;;  %p124_p8 = scmp.eq.s32.totalorder %s437_s17, 1 }
  0x11   : > { %s949_s22 = scalar_select %p744_p6, 1, 0 }
  0x12   : > { %p485_p10 = scmp.lt.s32.totalorder %s679_s15, 2  ;;  %p751_p11 = por %p118_p7, %p36_p0 }
  0x13   : > { %p755_p12 = por %p124_p8, %p42_p3  ;;  %s144_s25 = sand.u32 1, %s675_s14  }
  0x14   : > { %s950_s23 = scalar_select %p751_p11, 1, 0 }
  0x15   : > { %s951_s24 = scalar_select %p755_p12, 1, 0 }
  0x16   : > { %s761_s26 = sshll.u32 %s679_s15, 9  ;;  %s765_s27 = sshll.u32 %s144_s25, 5 }
  0x17   : > { %p767_p13 = pnand %p485_p10, %p38_p5  ;;  %s163_s29 = sand.u32 1, %s679_s15  }
  0x18   : > { %s953_s1 = sld [smem:[#allocation12_spill]]  ;;  %s167_s6 = scalar_lea.vmem [#allocation5], %s765_s27 }
  0x19   : > { %s952_s28 = scalar_select %p767_p13, 1, 0 }
  0x1a   : > { %s175_s7 = sshll.u32 %s167_s6, 4  ;;  %s782_s8 = scalar_lea.sflag [#allocation6], %s163_s29  ;;  %s779_s7 = int_to_ptr.vmem [resolvable:$true] %s175_s7 }
  0x1b   : > { %p788_p2 = pneg %p767_p13 }
  0x1e   : > { %s776_s5 = scalar_lea.hbm %s953_s1, %s761_s26  ;;  %s524_s19 = scalar_lea.hbm %s953_s1, 1024 }
  0x1f   : > { %s519_s9 = scalar_lea.hbm %s776_s5, 512  ;;  %p525_p5 = scmp.lt.u32.totalorder %s776_s5, %s953_s1 }
  0x20   : > { %p520_p1 = scmp.ne.s32.totalorder %s776_s5, %s519_s9  ;;  %p526_p7 = scmp.lt.u32.totalorder %s524_s19, %s519_s9 }
  0x21   : > { %p528_p10 = scmp.lt.u32.totalorder %s519_s9, %s776_s5 }
  0x22   : > { %p522_p3 = pnand %p788_p2, %p520_p1  ;;  %p527_p8 = por %p526_p7, %p525_p5 }
  0x24   : > { %p523_p4 = pneg %p522_p3  ;;  %p529_p9 = por %p528_p10, %p527_p8 }
  0x26   : > { %p530_p0 = pnand %p529_p9, %p523_p4 }
  0x28   : > { %533 = shalt.err (!%p530_p0)
}
  0x29   : > { %s534_s29 = scalar_lea.vmem %s779_s7, 512  ;;  %s681_s4 = smov [#allocation5]  }
  0x2a   : > { %p535_p1 = scmp.ne.s32.totalorder %s779_s7, %s534_s29  ;;  %s539_s6 = sshll.u32 %s681_s4, 4  ;;  %s540_s6 = int_to_ptr.vmem [resolvable:$false] %s539_s6 }
  0x2b   : > { %s541_s11 = scalar_lea.vmem %s540_s6, 1024  ;;  %p542_p11 = scmp.lt.s32.totalorder %s779_s7, %s540_s6 }
  0x2c   : > { %p537_p3 = pnand %p535_p1, %p788_p2  ;;  %p543_p6 = scmp.lt.s32.totalorder %s541_s11, %s534_s29 }
  0x2e   : > { %p538_p12 = pneg %p537_p3  ;;  %p544_p5 = por %p543_p6, %p542_p11 }
  0x30   : > { %p545_p7 = pnand %p544_p5, %p538_p12 }
  0x32   : > { %548 = shalt.err (!%p545_p7)
}
  0x33   : > { %477 = dma.hbm_to_vmem [thread:$0]  (!%p767_p13), %s776_s5, 512, %s779_s7, %s782_s8  }
  0x34   : > { %p199_p9 = scmp.lt.s32.totalorder %s679_s15, 3  ;;  %s817_s19 = scalar_lea.hbm %s940_s0, %s761_s26 }
  0x35   : > { %p955_p6 = scmp.ge.s32.totalorder %s679_s15, 1  ;;  %s148_s30 = scalar_lea.vmem [#allocation2], %s765_s27 }
  0x36   : > { %s156_s29 = sshll.u32 %s148_s30, 4  ;;  %s145_s5 = scalar_lea.sflag [#allocation3], %s144_s25  ;;  %s157_s29 = int_to_ptr.vmem [resolvable:$true] %s156_s29 }
  0x37   : > { %p821_p11 = pnand %p955_p6, %p199_p9  ;;  %s549_s7 = scalar_lea.hbm %s817_s19, 512 }
  0x38   : > { %p550_p12 = scmp.ne.s32.totalorder %s817_s19, %s549_s7  ;;  %s554_s11 = scalar_lea.hbm %s940_s0, 1024 }
  0x39   : > { %s956_s20 = scalar_select %p821_p11, 1, 0 }
  0x3a   : > { %p552_p0 = pnand %p550_p12, %p788_p2  ;;  %p555_p8 = scmp.lt.u32.totalorder %s817_s19, %s940_s0 }
  0x3b   : > { %p556_p10 = scmp.lt.u32.totalorder %s554_s11, %s549_s7  ;;  %p558_p3 = scmp.lt.u32.totalorder %s549_s7, %s817_s19 }
  0x3c   : > { %p553_p4 = pneg %p552_p0 }
  0x3d   : > { %p557_p1 = por %p556_p10, %p555_p8 }
  0x3f   : > { %p559_p5 = por %p558_p3, %p557_p1 }
  0x41   : > { %p560_p7 = pnand %p559_p5, %p553_p4 }
  0x43   : > { %563 = shalt.err (!%p560_p7)
}
  0x44   : > { %s564_s25 = scalar_lea.vmem %s157_s29, 512  ;;  %s682_s30 = smov [#allocation2]  }
  0x45   : > { %p565_p9 = scmp.ne.s32.totalorder %s157_s29, %s564_s25  ;;  %s569_s1 = sshll.u32 %s682_s30, 4  ;;  %s570_s1 = int_to_ptr.vmem [resolvable:$false] %s569_s1 }
  0x46   : > { %s571_s4 = scalar_lea.vmem %s570_s1, 1024  ;;  %p572_p0 = scmp.lt.s32.totalorder %s157_s29, %s570_s1 }
  0x47   : > { %p567_p6 = pnand %p565_p9, %p788_p2  ;;  %p573_p11 = scmp.lt.s32.totalorder %s571_s4, %s564_s25 }
  0x49   : > { %p568_p12 = pneg %p567_p6  ;;  %p574_p13 = por %p573_p11, %p572_p0 }
  0x4b   : > { %p575_p8 = pnand %p574_p13, %p568_p12 }
  0x4d   : > { %578 = shalt.err (!%p575_p8)
}
  0x4e   : > { %p957_p10 = scmp.ne.s32.totalorder %s952_s28, 0  ;;  %s849_s11 = scalar_lea.hbm %s942_s2, %s761_s26 }
  0x4f   : > { %s186_s1 = scalar_lea.vmem [#allocation7], %s765_s27  ;;  %s579_s17 = scalar_lea.hbm %s849_s11, 512 }
  0x50   : > { %474 = dma.hbm_to_vmem [thread:$0]  (!%p957_p10), %s817_s19, 512, %s157_s29, %s145_s5  }
  0x51   : > { %s194_s9 = sshll.u32 %s186_s1, 4  ;;  %p580_p13 = scmp.ne.s32.totalorder %s849_s11, %s579_s17  ;;  %s195_s9 = int_to_ptr.vmem [resolvable:$true] %s194_s9 }
  0x52   : > { %s584_s19 = scalar_lea.hbm %s942_s2, 1024  ;;  %p585_p1 = scmp.lt.u32.totalorder %s849_s11, %s942_s2 }
  0x53   : > { %p582_p11 = pnand %p580_p13, %p788_p2  ;;  %p586_p3 = scmp.lt.u32.totalorder %s584_s19, %s579_s17 }
  0x54   : > { %p588_p7 = scmp.lt.u32.totalorder %s579_s17, %s849_s11 }
  0x55   : > { %p583_p4 = pneg %p582_p11  ;;  %p587_p5 = por %p586_p3, %p585_p1 }
  0x57   : > { %p589_p9 = por %p588_p7, %p587_p5 }
  0x59   : > { %p590_p6 = pnand %p589_p9, %p583_p4 }
  0x5b   : > { %593 = shalt.err (!%p590_p6)
}
  0x5c   : > { %s594_s26 = scalar_lea.vmem %s195_s9, 512  ;;  %s683_s27 = smov [#allocation7]  }
  0x5d   : > { %p595_p12 = scmp.ne.s32.totalorder %s195_s9, %s594_s26  ;;  %s599_s4 = sshll.u32 %s683_s27, 4  ;;  %s600_s4 = int_to_ptr.vmem [resolvable:$false] %s599_s4 }
  0x5e   : > { %s601_s7 = scalar_lea.vmem %s600_s4, 1024  ;;  %p602_p13 = scmp.lt.s32.totalorder %s195_s9, %s600_s4 }
  0x5f   : > { %p597_p0 = pnand %p595_p12, %p788_p2  ;;  %p603_p11 = scmp.lt.s32.totalorder %s601_s7, %s594_s26 }
  0x61   : > { %p598_p8 = pneg %p597_p0  ;;  %p604_p10 = por %p603_p11, %p602_p13 }
  0x63   : > { %p605_p1 = pnand %p604_p10, %p598_p8 }
  0x65   : > { %608 = shalt.err (!%p605_p1)
}
  0x66   : > { %p958_p3 = scmp.ne.s32.totalorder %s952_s28, 0  ;;  %p959_p4 = scmp.ne.s32.totalorder %s956_s20, 0 }
  0x67   : > { %s873_s10 = sand.u32 (!%p959_p4), 1, %s671_s13   ;;  %p960_p2 = scmp.ne.s32.totalorder (!%p959_p4), %s949_s22, 0 }
  0x68   : > { %480 = dma.hbm_to_vmem [thread:$0]  (!%p958_p3), %s849_s11, 512, %s195_s9, %s782_s8  }
  0x69   : > { %203 = sbr.rel (%p959_p4) target bundleno = 144 (0x90), region = 32  ;;  %s876_s6 = sshll.u32 (!%p959_p4), %s873_s10, 5 }
  0x6a   : > { %s206_s1 = scalar_lea.sflag (!%p959_p4), [#allocation3], %s873_s10  ;;  %s209_s17 = scalar_lea.vmem (!%p959_p4), [#allocation2], %s876_s6 }
  0x70   : > { %654 = dma.done.wait (%p960_p2), %s206_s1, 512  }
  0x71   : > { %656 = vsyncadd (%p960_p2), %s206_s1, 4294966784  ;;  %s214_s28 = sand.u32 1, %s726_s16   ;;  %s218_s20 = scalar_lea.vmem [#allocation5], %s876_s6 }
  0x72   : > { %s215_s8 = scalar_lea.sflag [#allocation6], %s214_s28 }
  0x73   : > { %658 = dma.done.wait (%p960_p2), %s215_s8, 1024  }
  0x74   : > { %660 = vsyncadd (%p960_p2), %s215_s8, 4294966272  ;;  %v261_v0 = vld [vmem:[%s218_s20] sm:$0xff]  ;;  %s227_s11 = scalar_lea.vmem [#allocation7], %s876_s6  ;;  %v275_v6 = vld [vmem:[%s209_s17 + $0x10] sm:$0xff]  ;;  %s259_s22 = scalar_lea.vmem [#allocation8], %s876_s6 }
  0x75   : > { %v262_v1 = vld [vmem:[%s227_s11] sm:$0xff]  ;;  %v266_v2 = vld [vmem:[%s227_s11 + $0x8] sm:$0xff]  ;;  %v269_v3 = vld [vmem:[%s227_s11 + $0x10] sm:$0xff]  ;;  %v276_v16 = vmul.f32 0.57735026, %v275_v6  ;;  %s324_s9 = sshll.u32 %s259_s22, 4  ;;  %s893_s9 = int_to_ptr.vmem [resolvable:$true] %s324_s9 }
  0x76   : > { %v272_v4 = vld [vmem:[%s227_s11 + $0x18] sm:$0xff]  ;;  %v263_v5 = vmul.f32 %v262_v1, %v261_v0  ;;  %v277_v7 = vld [vmem:[%s218_s20 + $0x8] sm:$0xff]  ;;  %v279_v8 = vld [vmem:[%s218_s20 + $0x10] sm:$0xff]  ;;  %v267_v13 = vmul.f32 %v266_v2, %v261_v0  ;;  %v270_v15 = vmul.f32 %v269_v3, %v261_v0  ;;  %s462_s25 = sshll.u32 %s726_s16, 9  ;;  %s310_s16 = scalar_lea.sflag [#allocation4], %s873_s10 }
  0x77   : > { %v260_v9 = vld [vmem:[%s209_s17] sm:$0xff]  ;;  %v278_v10 = vmul.f32 %v277_v7, %v266_v2  ;;  %v280_v11 = vmul.f32 %v279_v8, %v269_v3  ;;  %v282_v12 = vld [vmem:[%s218_s20 + $0x18] sm:$0xff]  ;;  %v265_v18 = vld [vmem:[%s209_s17 + $0x8] sm:$0xff]  ;;  %v289_v19 = vmul.f32 %v279_v8, %v272_v4  ;;  %v273_v20 = vmul.f32 %v272_v4, %v261_v0  ;;  %s898_s29 = scalar_lea.hbm %s943_s3, %s462_s25  ;;  %s609_s5 = scalar_lea.vmem %s893_s9, 512 }
  0x78   : > { %v287_v14 = vld [vmem:[%s209_s17 + $0x18] sm:$0xff]  ;;  %v283_v17 = vmul.f32 %v282_v12, %v272_v4  ;;  %v290_v23 = vmul.f32 %v282_v12, %v269_v3  ;;  %v294_v24 = vmul.f32 %v277_v7, %v272_v4  ;;  %v264_v25 = vmul.f32 %v263_v5, %v260_v9  ;;  %p610_p10 = scmp.ne.s32.totalorder %s893_s9, %s609_s5  ;;  %p961_p5 = scmp.ne.s32.totalorder %s950_s23, 0 }
  0x79   : > { %v281_v21 = vadd.f32 %v280_v11, %v278_v10  ;;  %v288_v22 = vmul.f32 0.70710677, %v287_v14  ;;  %v296_v26 = vmul.f32 %v282_v12, %v266_v2  ;;  %v300_v27 = vmul.f32 %v277_v7, %v269_v3  ;;  %s684_s26 = smov [#allocation8]  }
  0x7a   : > { %v301_v28 = vmul.f32 %v279_v8, %v266_v2  ;;  %v268_v30 = vmul.f32 %v267_v13, %v265_v18  ;;  %v291_v31 = vsub.f32 %v289_v19, %v290_v23  ;;  %v295_v32 = vsub.f32 0.0, %v294_v24  ;;  %p611_p7 = pnand %p610_p10, %p961_p5  ;;  %s613_s27 = sshll.u32 %s684_s26, 4  ;;  %s614_s27 = int_to_ptr.vmem [resolvable:$false] %s613_s27 }
  0x7b   : > { %v284_v29 = vadd.f32 %v283_v17, %v281_v21  ;;  %v274_v33 = vmul.f32 %v273_v20, %v265_v18  ;;  %v271_v37 = vmul.f32 %v270_v15, %v265_v18  ;;  %s615_s4 = scalar_lea.vmem %s614_s27, 1024  ;;  %p616_p6 = scmp.lt.s32.totalorder %s893_s9, %s614_s27 }
  0x7c   : > { %v302_v34 = vsub.f32 %v300_v27, %v301_v28  ;;  %v292_v36 = vmul.f32 %v291_v31, %v288_v22  ;;  %v297_v38 = vadd.f32 %v296_v26, %v295_v32  ;;  %p612_p9 = pneg %p611_p7  ;;  %p617_p12 = scmp.lt.s32.totalorder %s615_s4, %s609_s5 }
  0x7d   : > { %v285_v35 = vmul.f32 %v284_v29, %v276_v16 }
  0x7e   : > { %v303_v39 = vmul.f32 %v302_v34, %v288_v22  ;;  %v293_v41 = vadd.f32 %v292_v36, %v268_v30  ;;  %v298_v42 = vmul.f32 %v297_v38, %v288_v22  ;;  %p618_p0 = por %p617_p12, %p616_p6 }
  0x7f   : > { %v286_v40 = vadd.f32 %v285_v35, %v264_v25 }
  0x80   : > { %v304_v43 = vadd.f32 %v303_v39, %v274_v33  ;;  %306 = vst [vmem:[%s259_s22 + $0x8] sm:$0xff] %v293_v41  ;;  %v299_v44 = vadd.f32 %v298_v42, %v271_v37  ;;  %p619_p8 = pnand %p618_p0, %p612_p9 }
  0x81   : > { %305 = vst [vmem:[%s259_s22] sm:$0xff] %v286_v40 }
  0x82   : > { %308 = vst [vmem:[%s259_s22 + $0x18] sm:$0xff] %v304_v43  ;;  %307 = vst [vmem:[%s259_s22 + $0x10] sm:$0xff] %v299_v44 }
  0x83   : > { %622 = shalt.err (!%p619_p8)
}
  0x84   : > { %s623_s7 = scalar_lea.hbm %s898_s29, 512  ;;  %s627_s1 = scalar_lea.hbm %s943_s3, 1024 }
  0x85   : > { %p624_p13 = scmp.ne.s32.totalorder %s898_s29, %s623_s7  ;;  %p628_p3 = scmp.lt.u32.totalorder %s898_s29, %s943_s3 }
  0x86   : > { %p629_p4 = scmp.lt.u32.totalorder %s627_s1, %s623_s7  ;;  %p631_p10 = scmp.lt.u32.totalorder %s623_s7, %s898_s29 }
  0x87   : > { %p625_p11 = pnand %p624_p13, %p961_p5 }
  0x88   : > { %p630_p2 = por %p629_p4, %p628_p3 }
  0x89   : > { %p626_p1 = pneg %p625_p11 }
  0x8a   : > { %p632_p7 = por %p631_p10, %p630_p2 }
  0x8c   : > { %p633_p9 = pnand %p632_p7, %p626_p1 }
  0x8e   : > { %636 = shalt.err (!%p633_p9)
}
  0x8f   : > { %469 = dma.vmem_to_hbm [thread:$0]  (%p961_p5), %s893_s9, 512, %s898_s29, %s310_s16  }
  0x90 PF: > { %s336_s8 = sand.u32 1, %s667_s12   ;;  %p962_p6 = scmp.ne.s32.totalorder %s951_s24, 0 }
  0x91   : > { %p963_p12 = scmp.ge.s32.totalorder %s679_s15, 2  ;;  %s337_s20 = scalar_lea.sflag [#allocation4], %s336_s8 }
  0x93   : > { %p482_p0 = pnand %p963_p12, %p962_p6 }
  0x95   : > { %662 = dma.done.wait (!%p482_p0), %s337_s20, 512  }
  0x96   : > { %664 = vsyncadd (!%p482_p0), %s337_s20, 4294966784  ;;  %p19_p8 = scmp.ge.s32.totalorder %s730_s18, 4   ;;  %s964_s12 = smov %s671_s13 }
  0x97   : > { %s965_s13 = smov %s675_s14  ;;  %s966_s14 = smov %s742_s21 }
  0x98   : > { %s967_s15 = smov %s730_s18  ;;  %21 = sbr.rel (!%p19_p8) target bundleno = 9 (0x9), region = 101 }
  0x9f   :  { %342 = vsyncpa [#allocation3], 1 }
  0xa0   :  { %344 = vsyncpa [#allocation3 + $0x1], 1 }
  0xa1   :  { %345 = vsyncpa [#allocation6], 1 }
  0xa2   :  { %347 = vsyncpa [#allocation6 + $0x1], 1 }
  0xa3   :  { %348 = vsyncpa [#allocation4], 1 }
  0xa4   :  { %350 = vsyncpa [#allocation4 + $0x1], 1 }

</bundles_post_ra>
